<compile_context>
chip_gen: v7x
topology: tpu7x:2x2x1
jax: 0.10.0
libtpu: 0.0.40
codegen_flags: <defaults>
</compile_context>

<pallas_src>
import functools

import jax
import jax.numpy as jnp
from jax.experimental import pallas as pl
from jax.experimental.pallas import tpu as pltpu

NOISE_LEVEL = 0.9          # matches NoisyReLU(noise_level=0.9) default
LANE = 128
SUBLANE = 8
MAX_WIDTH = 4096           # widest lane dimension we try for the 2D slab
TARGET_TILE_BYTES = 2 << 20  # ~2 MiB per f32 tile (x, noise, out each double-buffered)


def _noisy_relu_kernel(x_ref, noise_ref, o_ref, *, noise_level):
    # x_ref / noise_ref / o_ref: VMEM tiles of shape (TR, W)
    x = x_ref[...].astype(jnp.float32)
    n = noise_ref[...].astype(jnp.float32)
    o_ref[...] = jnp.maximum(x + n * noise_level, 0.0).astype(o_ref.dtype)


def _choose_slab(n):
    """Pick (rows, width, pad) for a lane-dense 2D view of n elements.

    Prefers a factorization with width a wide multiple of 128 and rows a
    multiple of 8 (no padding). Falls back to padding the flat tail only for
    genuinely ragged sizes.
    """
    w = (min(MAX_WIDTH, n) // LANE) * LANE
    while w >= LANE:
        if n % w == 0 and (n // w) % SUBLANE == 0:
            return n // w, w, 0
        w -= LANE
    # ragged size: pad the flat vector up to a multiple of (8, 512)
    width = 4 * LANE
    chunk = SUBLANE * width
    padded = ((n + chunk - 1) // chunk) * chunk
    return padded // width, width, padded - n


def noisy_relu(x, key, noise_level=NOISE_LEVEL):
    """relu(x + N(0,1) * noise_level), elementwise, any shape / float dtype."""
    orig_shape = x.shape
    n = x.size
    rows, width, pad = _choose_slab(n)

    flat = x.reshape(-1)
    if pad:
        flat = jnp.pad(flat, (0, pad))
    x2d = flat.reshape(rows, width)

    # Standard-normal noise generated directly at the slab shape (no extra pad op).
    noise2d = jax.random.normal(key, (rows, width), dtype=jnp.float32)

    # Row-tile size: ~TARGET_TILE_BYTES per f32 tile, multiple of 8, capped at rows.
    bytes_per_row = width * 4
    tr = max(SUBLANE, (TARGET_TILE_BYTES // bytes_per_row) // SUBLANE * SUBLANE)
    tr = min(tr, rows)

    grid = (pl.cdiv(rows, tr),)

    out2d = pl.pallas_call(
        functools.partial(_noisy_relu_kernel, noise_level=noise_level),
        out_shape=jax.ShapeDtypeStruct((rows, width), x.dtype),
        grid=grid,
        in_specs=[
            pl.BlockSpec((tr, width), lambda i: (i, 0)),   # x tile
            pl.BlockSpec((tr, width), lambda i: (i, 0)),   # noise tile
        ],
        out_specs=pl.BlockSpec((tr, width), lambda i: (i, 0)),
        compiler_params=pltpu.CompilerParams(
            dimension_semantics=("parallel",)),
    )(x2d, noise2d)

    if pad:
        return out2d.reshape(-1)[:n].reshape(orig_shape)
    return out2d.reshape(orig_shape)


if __name__ == "__main__":
    key = jax.random.PRNGKey(0)
    k_x, k_noise = jax.random.split(key)

    # small NCHW input consistent with a conv-net activation map
    x = jax.random.normal(k_x, (2, 4, 16, 16), dtype=jnp.float32)

    out = noisy_relu(x, k_noise)
    out = jax.block_until_ready(out)

    # sanity checks: shape/dtype preserved, ReLU => non-negative,
    # and the result matches the pure-JAX reference of the same computation.
    assert out.shape == x.shape
    assert out.dtype == x.dtype
    assert bool(jnp.all(out >= 0.0))

    rows, width, pad_amt = _choose_slab(x.size)
    noise_ref = jax.random.normal(k_noise, (rows, width), dtype=jnp.float32)
    ref = jnp.maximum(
        x + (noise_ref.reshape(-1)[: x.size].reshape(x.shape) * NOISE_LEVEL), 0.0
    )
    assert bool(jnp.allclose(out, ref, atol=1e-6))

    print("KERNEL_OK")
</pallas_src>

<mosaic_0001>
module attributes {stable_mosaic.version = 11 : i64} {
  func.func @_noisy_relu_kernel(%arg0: i32, %arg1: memref<8x256xf32, #tpu.memory_space<vmem>>, %arg2: memref<8x256xf32, #tpu.memory_space<vmem>>, %arg3: memref<8x256xf32, #tpu.memory_space<vmem>>) attributes {dimension_semantics = [#tpu.dimension_semantics<parallel>], iteration_bounds = array<i64: 1>, scalar_prefetch = 0 : i64, scratch_operands = 0 : i64, tpu.core_type = #tpu.core_type<tc>, window_params = [{transform_indices = @transform_0, window_bounds = array<i64: 8, 256>}, {transform_indices = @transform_1, window_bounds = array<i64: 8, 256>}, {transform_indices = @transform_2, window_bounds = array<i64: 8, 256>}]} {
    %c0 = arith.constant 0 : index
    %c0_0 = arith.constant 0 : index
    %0 = vector.load %arg1[%c0, %c0_0] : memref<8x256xf32, #tpu.memory_space<vmem>>, vector<8x256xf32>
    %c0_1 = arith.constant 0 : index
    %c0_2 = arith.constant 0 : index
    %1 = vector.load %arg2[%c0_1, %c0_2] : memref<8x256xf32, #tpu.memory_space<vmem>>, vector<8x256xf32>
    %cst = arith.constant 0.899999976 : f32
    %2 = vector.broadcast %cst : f32 to vector<8x256xf32>
    %3 = arith.mulf %1, %2 : vector<8x256xf32>
    %4 = arith.addf %0, %3 : vector<8x256xf32>
    %cst_3 = arith.constant 0.000000e+00 : f32
    %5 = vector.broadcast %cst_3 : f32 to vector<8x256xf32>
    %6 = arith.maximumf %4, %5 : vector<8x256xf32>
    %c0_4 = arith.constant 0 : index
    %c0_5 = arith.constant 0 : index
    %7 = vector.load %arg3[%c0_4, %c0_5] : memref<8x256xf32, #tpu.memory_space<vmem>>, vector<8x256xf32>
    tpu.vector_store %arg3[%c0_4, %c0_5], %6 {strides = array<i32>} : memref<8x256xf32, #tpu.memory_space<vmem>>, vector<8x256xf32>,
    return
  }
  func.func @transform_0(%arg0: i32) -> (i32, i32) {
    %c0_i32 = arith.constant 0 : i32
    %c0_i32_0 = arith.constant 0 : i32
    return %arg0, %c0_i32 : i32, i32
  }
  func.func @transform_1(%arg0: i32) -> (i32, i32) {
    %c0_i32 = arith.constant 0 : i32
    %c0_i32_0 = arith.constant 0 : i32
    return %arg0, %c0_i32 : i32, i32
  }
  func.func @transform_2(%arg0: i32) -> (i32, i32) {
    %c0_i32 = arith.constant 0 : i32
    %c0_i32_0 = arith.constant 0 : i32
    return %arg0, %c0_i32 : i32, i32
  }
}

</mosaic_0001>

<bundles_post_ra>
// kernel: tpu_custom_call.1
= control target key start
LH: loop header
LB: loop body
LE: loop exit
PB: predicated region body
PF: predicated region fallthrough
CT: control target
= control target key end

     0   :  { %7 = vsyncpa [#allocation3], 0  ;;  %s193_s0 = inlined_call_operand.hbm [shape: f32[8,256], index: 0, kind: input, shape index: {}]   ;;  %s194_s1 = inlined_call_operand.hbm [shape: f32[8,256], index: 1, kind: input, shape index: {}]   ;;  %s195_s2 = inlined_call_operand.hbm [shape: f32[8,256], index: 2, kind: output, shape index: {}]  }
   0x1   :  { %8 = vsyncpa [#allocation6], 0 }
   0x2   :  { %9 = vsyncpa [#allocation4], 0  ;;  %s139_s9 = smov [#allocation2]   ;;  %s140_s11 = smov [#allocation5]  }
   0x3   :  { %s16_s10 = sshll.u32 %s139_s9, 4  ;;  %s26_s12 = sshll.u32 %s140_s11, 4  ;;  %s17_s10 = int_to_ptr.vmem [resolvable:$true] %s16_s10  ;;  %s27_s12 = int_to_ptr.vmem [resolvable:$true] %s26_s12 }
   0x4   :  { %s67_s15 = scalar_lea.hbm %s193_s0, 256 }
   0x5   :  { %p68_p0 = scmp.ne.s32.totalorder %s193_s0, %s67_s15  ;;  %p71_p1 = scmp.lt.u32.totalorder %s67_s15, %s193_s0 }
   0x7   :  { %p73_p2 = pnand %p71_p1, %p68_p0 }
   0x9   :  { %76 = shalt.err (!%p73_p2)
}
   0xa   :  { %s77_s20 = scalar_lea.vmem %s17_s10, 256  ;;  %p82_p4 = scmp.lt.s32.totalorder %s17_s10, %s17_s10 }
   0xb   :  { %p78_p3 = scmp.ne.s32.totalorder %s17_s10, %s77_s20  ;;  %p83_p5 = scmp.lt.s32.totalorder %s77_s20, %s77_s20 }
   0xd   :  { %p84_p6 = por %p83_p5, %p82_p4 }
   0xf   :  { %p85_p7 = pnand %p84_p6, %p78_p3 }
  0x11   :  { %88 = shalt.err (!%p85_p7)
}
  0x12   :  { %19 = dma.hbm_to_vmem [thread:$0]  %s193_s0, 256, %s17_s10, [#allocation3]  }
  0x13   :  { %s89_s25 = scalar_lea.hbm %s194_s1, 256 }
  0x14   :  { %p90_p8 = scmp.ne.s32.totalorder %s194_s1, %s89_s25  ;;  %p93_p9 = scmp.lt.u32.totalorder %s89_s25, %s194_s1 }
  0x16   :  { %p95_p10 = pnand %p93_p9, %p90_p8 }
  0x18   :  { %98 = shalt.err (!%p95_p10)
}
  0x19   :  { %s99_s30 = scalar_lea.vmem %s27_s12, 256  ;;  %p104_p12 = scmp.lt.s32.totalorder %s27_s12, %s27_s12 }
  0x1a   :  { %p100_p11 = scmp.ne.s32.totalorder %s27_s12, %s99_s30  ;;  %p105_p13 = scmp.lt.s32.totalorder %s99_s30, %s99_s30 }
  0x1c   :  { %p106_p0 = por %p105_p13, %p104_p12 }
  0x1e   :  { %p107_p1 = pnand %p106_p0, %p100_p11 }
  0x20   :  { %110 = shalt.err (!%p107_p1)
}
  0x21   :  { %29 = dma.hbm_to_vmem [thread:$0]  %s194_s1, 256, %s27_s12, [#allocation6]  }
  0x22   :  { %133 = dma.done.wait [#allocation3], 256  }
  0x23   :  { %134 = vsyncadd [#allocation3], 4294967040 }
  0x24   :  { %135 = dma.done.wait [#allocation6], 256  }
  0x25   :  { %136 = vsyncadd [#allocation6], 4294967040  ;;  %v36_v0 = vld [vmem:[#allocation2] sm:$0xff]  ;;  %v38_v1 = vld [vmem:[#allocation5] sm:$0xff]  ;;  %s141_s4 = smov [#allocation7]  }
  0x26   :  { %v40_v2 = vmul.f32 0.9, %v38_v1  ;;  %v37_v3 = vld [vmem:[#allocation2 + $0x8] sm:$0xff]  ;;  %v39_v4 = vld [vmem:[#allocation5 + $0x8] sm:$0xff]  ;;  %s54_s5 = sshll.u32 %s141_s4, 4  ;;  %s55_s5 = int_to_ptr.vmem [resolvable:$true] %s54_s5 }
  0x27   :  { %v41_v5 = vmul.f32 0.9, %v39_v4  ;;  %s111_s1 = scalar_lea.vmem %s55_s5, 256  ;;  %p116_p3 = scmp.lt.s32.totalorder %s55_s5, %s55_s5 }
  0x28   :  { %v42_v6 = vadd.f32 %v40_v2, %v36_v0  ;;  %p112_p2 = scmp.ne.s32.totalorder %s55_s5, %s111_s1  ;;  %p117_p4 = scmp.lt.s32.totalorder %s111_s1, %s111_s1 }
  0x29   :  { %v43_v7 = vadd.f32 %v41_v5, %v37_v3 }
  0x2a   :  { %v44_v8 = vmax.f32 %v42_v6, 0.0  ;;  %p118_p5 = por %p117_p4, %p116_p3 }
  0x2b   :  { %v45_v9 = vmax.f32 %v43_v7, 0.0 }
  0x2c   :  { %46 = vst [vmem:[#allocation7] sm:$0xff] %v44_v8  ;;  %p119_p6 = pnand %p118_p5, %p112_p2 }
  0x2d   :  { %47 = vst [vmem:[#allocation7 + $0x8] sm:$0xff] %v45_v9 }
  0x2e   :  { %122 = shalt.err (!%p119_p6)
}
  0x2f   :  { %s123_s8 = scalar_lea.hbm %s195_s2, 256 }
  0x30   :  { %p124_p7 = scmp.ne.s32.totalorder %s195_s2, %s123_s8  ;;  %p127_p8 = scmp.lt.u32.totalorder %s123_s8, %s195_s2 }
  0x32   :  { %p129_p9 = pnand %p127_p8, %p124_p7 }
  0x34   :  { %132 = shalt.err (!%p129_p9)
}
  0x35   :  { %57 = dma.vmem_to_hbm [thread:$0]  %s55_s5, 256, %s195_s2, [#allocation4]  }
  0x36   :  { %137 = dma.done.wait [#allocation4], 256  }
  0x37   :  { %138 = vsyncadd [#allocation4], 4294967040 }
  0x38   :  { %61 = vsyncpa [#allocation3], 1 }
  0x39   :  { %62 = vsyncpa [#allocation6], 1 }
  0x3a   :  { %63 = vsyncpa [#allocation4], 1 }

</bundles_post_ra>
